<compile_context>
chip_gen: v7x
topology: tpu7x:2x2x1
jax: 0.10.0
libtpu: 0.0.40
codegen_flags: <defaults>
</compile_context>

<pallas_src>
import functools

import jax
import jax.numpy as jnp
from jax import lax
from jax.experimental import pallas as pl
from jax.experimental.pallas import tpu as pltpu

_LANE = 128
_NEG_PAD = -1e30  # softmax of padded lanes underflows to exactly 0 -> contributes 0


def _round_up(x, m):
    return (x + m - 1) // m * m


def _choose_tile_b(batch, c, itemsize):
    # Target ~512 rows per block, but keep 3 inputs * 2 pipeline buffers under a
    # conservative budget so double-buffering survives on every generation.
    budget = 12 * 1024 * 1024
    tile = 512
    while tile > 64 and 3 * 2 * tile * c * itemsize > budget:
        tile //= 2
    if batch <= tile:
        return batch  # single full-extent block (always layout-legal)
    return tile       # multiple of 8 by construction


def _triplet_l2sq_kernel(a_ref, p_ref, n_ref, out_ref, *, tile_b, batch, c_pad):
    i = pl.program_id(0)

    a = a_ref[...].astype(jnp.float32)
    p = p_ref[...].astype(jnp.float32)
    n = n_ref[...].astype(jnp.float32)

    def softmax_rows(x):
        m = jnp.max(x, axis=1, keepdims=True)
        e = jnp.exp(x - m)
        # approx=True -> EUP vrcp slot, otherwise idle between the exp pushes.
        return e * pl.reciprocal(jnp.sum(e, axis=1, keepdims=True), approx=True)

    sa = softmax_rows(a)  # pred_anchor is .detach()'d in torch; forward value identical
    sp = softmax_rows(p)
    sn = softmax_rows(n)

    # l2_dist_square(pos) - l2_dist_square(neg), kept un-reduced along the class
    # (lane) axis; only rows (sublanes) are reduced in-kernel so the output block
    # stays lane-dense. The wrapper finishes the reduction + mean.
    diff = (sa - sp) ** 2 - (sa - sn) ** 2  # [tile_b, c_pad]

    # Mask rows past the true batch size (tail block when B % tile_b != 0).
    row_ids = i * tile_b + lax.broadcasted_iota(jnp.int32, (tile_b, 1), 0)
    diff = jnp.where(row_ids < batch, diff, 0.0)

    out_ref[...] = jnp.sum(diff, axis=0, keepdims=True).reshape(1, 1, c_pad)


def triplet_loss_in_logistic_dist(pred_anchor, pred_pos, pred_neg):
    """Forward pass of TripletLossInLogisticDist (l2_square, mean reduction)."""
    B, C = pred_anchor.shape
    assert pred_pos.shape == (B, C) and pred_neg.shape == (B, C)

    # Lane alignment: pad the class axis only when it is large and misaligned;
    # for C < 128 a full-extent lane block is cheaper than inflating HBM bytes.
    if C > _LANE and C % _LANE != 0:
        c_pad = _round_up(C, _LANE)
        pad = [(0, 0), (0, c_pad - C)]
        pred_anchor = jnp.pad(pred_anchor, pad, constant_values=_NEG_PAD)
        pred_pos = jnp.pad(pred_pos, pad, constant_values=_NEG_PAD)
        pred_neg = jnp.pad(pred_neg, pad, constant_values=_NEG_PAD)
    else:
        c_pad = C

    itemsize = jnp.dtype(pred_anchor.dtype).itemsize
    tile_b = _choose_tile_b(B, c_pad, itemsize)
    num_tiles = pl.cdiv(B, tile_b)

    kernel = functools.partial(
        _triplet_l2sq_kernel, tile_b=tile_b, batch=B, c_pad=c_pad
    )

    in_spec = pl.BlockSpec((tile_b, c_pad), lambda i: (i, 0))

    partials = pl.pallas_call(
        kernel,
        out_shape=jax.ShapeDtypeStruct((num_tiles, 1, c_pad), jnp.float32),
        grid_spec=pltpu.PrefetchScalarGridSpec(
            num_scalar_prefetch=0,
            grid=(num_tiles,),
            in_specs=[in_spec, in_spec, in_spec],
            out_specs=pl.BlockSpec((1, 1, c_pad), lambda i: (i, 0, 0)),
        ),
        compiler_params=pltpu.CompilerParams(
            dimension_semantics=("parallel",),
            vmem_limit_bytes=32 * 1024 * 1024,
        ),
    )(pred_anchor, pred_pos, pred_neg)

    # reduction == 'mean' over the true batch (masked tail rows contributed 0).
    return jnp.sum(partials) * (1.0 / B)


def _reference(pred_anchor, pred_pos, pred_neg):
    sa = jax.nn.softmax(pred_anchor.astype(jnp.float32), axis=1)
    sp = jax.nn.softmax(pred_pos.astype(jnp.float32), axis=1)
    sn = jax.nn.softmax(pred_neg.astype(jnp.float32), axis=1)
    pos_d = jnp.sum((sa - sp) ** 2, axis=1)
    neg_d = jnp.sum((sa - sn) ** 2, axis=1)
    return jnp.mean(pos_d - neg_d)


if __name__ == "__main__":
    key = jax.random.PRNGKey(0)
    k1, k2, k3 = jax.random.split(key, 3)

    B, C = 8, 32  # batch, num_classes (small test shapes)
    pred_anchor = jax.random.normal(k1, (B, C), dtype=jnp.float32)
    pred_pos = jax.random.normal(k2, (B, C), dtype=jnp.float32)
    pred_neg = jax.random.normal(k3, (B, C), dtype=jnp.float32)

    loss = triplet_loss_in_logistic_dist(pred_anchor, pred_pos, pred_neg)
    jax.block_until_ready(loss)

    ref = _reference(pred_anchor, pred_pos, pred_neg)
    # Tolerance loosened slightly: approx reciprocal (EUP vrcp) has ~1e-3 rel
    # error on the softmax probabilities.
    assert jnp.allclose(loss, ref, atol=1e-3, rtol=1e-3), (loss, ref)

    print("KERNEL_OK")
</pallas_src>

<mosaic_0001>
module attributes {stable_mosaic.version = 11 : i64} {
  func.func @_triplet_l2sq_kernel(%arg0: i32, %arg1: memref<8x32xf32, #tpu.memory_space<vmem>>, %arg2: memref<8x32xf32, #tpu.memory_space<vmem>>, %arg3: memref<8x32xf32, #tpu.memory_space<vmem>>, %arg4: memref<1x1x32xf32, #tpu.memory_space<vmem>>) attributes {dimension_semantics = [#tpu.dimension_semantics<parallel>], iteration_bounds = array<i64: 1>, scalar_prefetch = 0 : i64, scratch_operands = 0 : i64, tpu.core_type = #tpu.core_type<tc>, window_params = [{transform_indices = @transform_0, window_bounds = array<i64: 8, 32>}, {transform_indices = @transform_1, window_bounds = array<i64: 8, 32>}, {transform_indices = @transform_2, window_bounds = array<i64: 8, 32>}, {transform_indices = @transform_3, window_bounds = array<i64: 1, 1, 32>}]} {
    %c0 = arith.constant 0 : index
    %c0_0 = arith.constant 0 : index
    %0 = vector.load %arg1[%c0, %c0_0] : memref<8x32xf32, #tpu.memory_space<vmem>>, vector<8x32xf32>
    %c0_1 = arith.constant 0 : index
    %c0_2 = arith.constant 0 : index
    %1 = vector.load %arg2[%c0_1, %c0_2] : memref<8x32xf32, #tpu.memory_space<vmem>>, vector<8x32xf32>
    %c0_3 = arith.constant 0 : index
    %c0_4 = arith.constant 0 : index
    %2 = vector.load %arg3[%c0_3, %c0_4] : memref<8x32xf32, #tpu.memory_space<vmem>>, vector<8x32xf32>
    %cst = arith.constant dense<0xFF800000> : vector<8xf32>
    %3 = vector.multi_reduction <maximumf>, %0, %cst [1] : vector<8x32xf32> to vector<8xf32>
    %4 = vector.shape_cast %3 : vector<8xf32> to vector<8x1xf32>
    %5 = vector.broadcast %4 : vector<8x1xf32> to vector<8x32xf32>
    %6 = arith.subf %0, %5 : vector<8x32xf32>
    %7 = math.exp %6 : vector<8x32xf32>
    %cst_5 = arith.constant dense<0.000000e+00> : vector<8xf32>
    %8 = vector.multi_reduction <add>, %7, %cst_5 [1] : vector<8x32xf32> to vector<8xf32>
    %9 = vector.shape_cast %8 : vector<8xf32> to vector<8x1xf32>
    %10 = tpu.reciprocal %9 {approx = true} : vector<8x1xf32> -> vector<8x1xf32>
    %11 = vector.broadcast %10 : vector<8x1xf32> to vector<8x32xf32>
    %12 = arith.mulf %7, %11 : vector<8x32xf32>
    %cst_6 = arith.constant dense<0xFF800000> : vector<8xf32>
    %13 = vector.multi_reduction <maximumf>, %1, %cst_6 [1] : vector<8x32xf32> to vector<8xf32>
    %14 = vector.shape_cast %13 : vector<8xf32> to vector<8x1xf32>
    %15 = vector.broadcast %14 : vector<8x1xf32> to vector<8x32xf32>
    %16 = arith.subf %1, %15 : vector<8x32xf32>
    %17 = math.exp %16 : vector<8x32xf32>
    %cst_7 = arith.constant dense<0.000000e+00> : vector<8xf32>
    %18 = vector.multi_reduction <add>, %17, %cst_7 [1] : vector<8x32xf32> to vector<8xf32>
    %19 = vector.shape_cast %18 : vector<8xf32> to vector<8x1xf32>
    %20 = tpu.reciprocal %19 {approx = true} : vector<8x1xf32> -> vector<8x1xf32>
    %21 = vector.broadcast %20 : vector<8x1xf32> to vector<8x32xf32>
    %22 = arith.mulf %17, %21 : vector<8x32xf32>
    %cst_8 = arith.constant dense<0xFF800000> : vector<8xf32>
    %23 = vector.multi_reduction <maximumf>, %2, %cst_8 [1] : vector<8x32xf32> to vector<8xf32>
    %24 = vector.shape_cast %23 : vector<8xf32> to vector<8x1xf32>
    %25 = vector.broadcast %24 : vector<8x1xf32> to vector<8x32xf32>
    %26 = arith.subf %2, %25 : vector<8x32xf32>
    %27 = math.exp %26 : vector<8x32xf32>
    %cst_9 = arith.constant dense<0.000000e+00> : vector<8xf32>
    %28 = vector.multi_reduction <add>, %27, %cst_9 [1] : vector<8x32xf32> to vector<8xf32>
    %29 = vector.shape_cast %28 : vector<8xf32> to vector<8x1xf32>
    %30 = tpu.reciprocal %29 {approx = true} : vector<8x1xf32> -> vector<8x1xf32>
    %31 = vector.broadcast %30 : vector<8x1xf32> to vector<8x32xf32>
    %32 = arith.mulf %27, %31 : vector<8x32xf32>
    %33 = arith.subf %12, %22 : vector<8x32xf32>
    %34 = arith.mulf %33, %33 : vector<8x32xf32>
    %35 = arith.subf %12, %32 : vector<8x32xf32>
    %36 = arith.mulf %35, %35 : vector<8x32xf32>
    %37 = arith.subf %34, %36 : vector<8x32xf32>
    %c8_i32 = arith.constant 8 : i32
    %38 = arith.muli %arg0, %c8_i32 : i32
    %39 = tpu.iota {dimensions = array<i32: 0>} : vector<8x1xi32>
    %40 = vector.broadcast %38 : i32 to vector<8x1xi32>
    %41 = arith.addi %40, %39 : vector<8x1xi32>
    %c8_i32_10 = arith.constant 8 : i32
    %42 = vector.broadcast %c8_i32_10 : i32 to vector<8x1xi32>
    %43 = arith.cmpi slt, %41, %42 : vector<8x1xi32>
    %cst_11 = arith.constant 0.000000e+00 : f32
    %44 = vector.shape_cast %43 : vector<8x1xi1> to vector<8x1xi1>
    %45 = vector.broadcast %44 : vector<8x1xi1> to vector<8x32xi1>
    %46 = vector.broadcast %cst_11 : f32 to vector<8x32xf32>
    %47 = arith.select %45, %37, %46 : vector<8x32xi1>, vector<8x32xf32>
    %cst_12 = arith.constant dense<0.000000e+00> : vector<32xf32>
    %48 = vector.multi_reduction <add>, %47, %cst_12 [0] : vector<8x32xf32> to vector<32xf32>
    %49 = vector.shape_cast %48 : vector<32xf32> to vector<1x32xf32>
    %50 = vector.shape_cast %49 : vector<1x32xf32> to vector<1x1x32xf32>
    %c0_13 = arith.constant 0 : index
    %c0_14 = arith.constant 0 : index
    %c0_15 = arith.constant 0 : index
    %51 = vector.load %arg4[%c0_13, %c0_14, %c0_15] : memref<1x1x32xf32, #tpu.memory_space<vmem>>, vector<1x1x32xf32>
    tpu.vector_store %arg4[%c0_13, %c0_14, %c0_15], %50 {strides = array<i32>} : memref<1x1x32xf32, #tpu.memory_space<vmem>>, vector<1x1x32xf32>,
    return
  }
  func.func @transform_0(%arg0: i32) -> (i32, i32) {
    %c0_i32 = arith.constant 0 : i32
    %c0_i32_0 = arith.constant 0 : i32
    return %arg0, %c0_i32 : i32, i32
  }
  func.func @transform_1(%arg0: i32) -> (i32, i32) {
    %c0_i32 = arith.constant 0 : i32
    %c0_i32_0 = arith.constant 0 : i32
    return %arg0, %c0_i32 : i32, i32
  }
  func.func @transform_2(%arg0: i32) -> (i32, i32) {
    %c0_i32 = arith.constant 0 : i32
    %c0_i32_0 = arith.constant 0 : i32
    return %arg0, %c0_i32 : i32, i32
  }
  func.func @transform_3(%arg0: i32) -> (i32, i32, i32) {
    %c0_i32 = arith.constant 0 : i32
    %c0_i32_0 = arith.constant 0 : i32
    %c0_i32_1 = arith.constant 0 : i32
    return %arg0, %c0_i32, %c0_i32_0 : i32, i32, i32
  }
}

</mosaic_0001>

<bundles_post_ra>
// kernel: tpu_custom_call.1
= control target key start
LH: loop header
LB: loop body
LE: loop exit
PB: predicated region body
PF: predicated region fallthrough
CT: control target
= control target key end

     0   :  { %8 = vsyncpa [#allocation3], 0  ;;  %s315_s0 = inlined_call_operand.hbm [shape: f32[8,32], index: 0, kind: input, shape index: {}]   ;;  %s316_s1 = inlined_call_operand.hbm [shape: f32[8,32], index: 1, kind: input, shape index: {}]   ;;  %s317_s2 = inlined_call_operand.hbm [shape: f32[8,32], index: 2, kind: input, shape index: {}]   ;;  %s318_s3 = inlined_call_operand.hbm [shape: f32[1,1,32], index: 3, kind: output, shape index: {}]  }
   0x1   :  { %9 = vsyncpa [#allocation6], 0 }
   0x2   :  { %10 = vsyncpa [#allocation4], 0  ;;  %s236_s12 = smov [#allocation5]   ;;  %s237_s14 = smov [#allocation2]  }
   0x3   :  { %s27_s13 = sshll.u32 %s236_s12, 4  ;;  %s17_s15 = sshll.u32 %s237_s14, 4  ;;  %s28_s13 = int_to_ptr.vmem [resolvable:$true] %s27_s13  ;;  %s18_s15 = int_to_ptr.vmem [resolvable:$true] %s17_s15 }
   0x4   :  { %s142_s18 = scalar_lea.hbm %s316_s1, 128 }
   0x5   :  { %p143_p0 = scmp.ne.s32.totalorder %s316_s1, %s142_s18  ;;  %p146_p1 = scmp.lt.u32.totalorder %s142_s18, %s316_s1 }
   0x7   :  { %p148_p2 = pnand %p146_p1, %p143_p0 }
   0x9   :  { %151 = shalt.err (!%p148_p2)
}
   0xa   :  { %s152_s23 = scalar_lea.vmem %s28_s13, 128  ;;  %p157_p4 = scmp.lt.s32.totalorder %s28_s13, %s28_s13 }
   0xb   :  { %p153_p3 = scmp.ne.s32.totalorder %s28_s13, %s152_s23  ;;  %p158_p5 = scmp.lt.s32.totalorder %s152_s23, %s152_s23 }
   0xd   :  { %p159_p6 = por %p158_p5, %p157_p4 }
   0xf   :  { %p160_p7 = pnand %p159_p6, %p153_p3 }
  0x11   :  { %163 = shalt.err (!%p160_p7)
}
  0x12   :  { %30 = dma.hbm_to_vmem [thread:$0]  %s316_s1, 128, %s28_s13, [#allocation6]  }
  0x13   :  { %s164_s28 = scalar_lea.hbm %s315_s0, 128 }
  0x14   :  { %p165_p8 = scmp.ne.s32.totalorder %s315_s0, %s164_s28  ;;  %p168_p9 = scmp.lt.u32.totalorder %s164_s28, %s315_s0 }
  0x16   :  { %p170_p10 = pnand %p168_p9, %p165_p8 }
  0x18   :  { %173 = shalt.err (!%p170_p10)
}
  0x19   :  { %s174_s6 = scalar_lea.vmem %s18_s15, 128  ;;  %p179_p12 = scmp.lt.s32.totalorder %s18_s15, %s18_s15 }
  0x1a   :  { %p175_p11 = scmp.ne.s32.totalorder %s18_s15, %s174_s6  ;;  %p180_p13 = scmp.lt.s32.totalorder %s174_s6, %s174_s6 }
  0x1c   :  { %p181_p0 = por %p180_p13, %p179_p12 }
  0x1e   :  { %p182_p1 = pnand %p181_p0, %p175_p11 }
  0x20   :  { %185 = shalt.err (!%p182_p1)
}
  0x21   :  { %20 = dma.hbm_to_vmem [thread:$0]  %s315_s0, 128, %s18_s15, [#allocation3]  }
  0x22   :  { %s238_s8 = smov [#allocation7]   ;;  %s186_s12 = scalar_lea.hbm %s317_s2, 128 }
  0x23   :  { %s37_s9 = sshll.u32 %s238_s8, 4  ;;  %p187_p2 = scmp.ne.s32.totalorder %s317_s2, %s186_s12  ;;  %s38_s9 = int_to_ptr.vmem [resolvable:$true] %s37_s9 }
  0x24   :  { %p190_p3 = scmp.lt.u32.totalorder %s186_s12, %s317_s2 }
  0x26   :  { %p192_p4 = pnand %p190_p3, %p187_p2 }
  0x28   :  { %195 = shalt.err (!%p192_p4)
}
  0x29   :  { %s196_s18 = scalar_lea.vmem %s38_s9, 128  ;;  %p201_p6 = scmp.lt.s32.totalorder %s38_s9, %s38_s9 }
  0x2a   :  { %p197_p5 = scmp.ne.s32.totalorder %s38_s9, %s196_s18  ;;  %p202_p7 = scmp.lt.s32.totalorder %s196_s18, %s196_s18 }
  0x2c   :  { %p203_p8 = por %p202_p7, %p201_p6 }
  0x2e   :  { %p204_p9 = pnand %p203_p8, %p197_p5 }
  0x30   :  { %207 = shalt.err (!%p204_p9)
}
  0x31   :  { %40 = dma.hbm_to_vmem [thread:$0]  %s317_s2, 128, %s38_s9, [#allocation6]  }
  0x32   :  { %230 = dma.done.wait [#allocation3], 128  }
  0x33   :  { %231 = vsyncadd [#allocation3], 4294967168 }
  0x34   :  { %232 = dma.done.wait [#allocation6], 256  }
  0x35   :  { %233 = vsyncadd [#allocation6], 4294967040  ;;  %vm53_vm0 = vcmask 261120   ;;  %v50_v0 = vld [vmem:[#allocation2] sm:$0xff]  ;;  %v52_v1 = vld [vmem:[#allocation7] sm:$0xff]  ;;  %s239_s2 = smov [#allocation8]  }
  0x36   :  { %v51_v2 = vld [vmem:[#allocation5] sm:$0xff]  ;;  %v54_v3 = vsel %vm53_vm0, %v50_v0, -inf  ;;  %v76_v4 = vsel %vm53_vm0, %v52_v1, -inf  ;;  %s116_s19 = sshll.u32 %s239_s2, 4  ;;  %vm108_vm1 = vcmask 253952   ;;  %s117_s19 = int_to_ptr.vmem [resolvable:$true] %s116_s19 }
  0x37   :  { %55 = vmax.xlane.f32.xlu0 %v54_v3  ;;  %77 = vmax.xlane.f32.xlu1 %v76_v4  ;;  %v65_v5 = vsel %vm53_vm0, %v51_v2, -inf  ;;  %s208_s20 = scalar_lea.vmem %s117_s19, 16  ;;  %s212_s21 = scalar_lea.vmem %s117_s19, 32 }
  0x38   :  { %p209_p10 = scmp.ne.s32.totalorder %s117_s19, %s208_s20  ;;  %p213_p11 = scmp.lt.s32.totalorder %s117_s19, %s117_s19 }
  0x39   :  { %p214_p12 = scmp.lt.s32.totalorder %s212_s21, %s208_s20 }
  0x3b   :  { %66 = vmax.xlane.f32.xlu0 %v65_v5  ;;  %p215_p13 = por %p214_p12, %p213_p11 }
  0x3d   :  { %p216_p0 = pnand %p215_p13, %p209_p10 }
  0xc4   :  { %v56_v6 = vpop.xlane.xlu0 %55  ;;  %v78_v7 = vpop.xlane.xlu1 %77 }
  0xc5   :  { %v57_v8 = vsub.f32 %v50_v0, %v56_v6  ;;  %v79_v9 = vsub.f32 %v52_v1, %v78_v7 }
  0xc7   :  { %v58_v10 = vmul.f32 1.442695, %v57_v8  ;;  %v80_v11 = vmul.f32 1.442695, %v79_v9 }
  0xc8   :  { %v67_v12 = vpop.xlane.xlu0 %66 }
  0xc9   :  { %130 = vpow2.f32 %v58_v10  ;;  %v68_v13 = vsub.f32 %v51_v2, %v67_v12 }
  0xca   :  { %132 = vpow2.f32 %v80_v11 }
  0xcb   :  { %v69_v14 = vmul.f32 1.442695, %v68_v13 }
  0xcd   :  { %134 = vpow2.f32 %v69_v14 }
  0xd3   :  { %v131_v15 = vpop.eup %130 }
  0xd4   :  { %v133_v16 = vpop.eup %132  ;;  %v60_v17 = vsel %vm53_vm0, %v131_v15, 0.0 }
  0xd5   :  { %61 = vadd.xlane.f32.xlu1 %v60_v17  ;;  %v82_v18 = vsel %vm53_vm0, %v133_v16, 0.0 }
  0xd7   :  { %v135_v19 = vpop.eup %134 }
  0xd8   :  { %v71_v20 = vsel %vm53_vm0, %v135_v19, 0.0 }
  0xd9   :  { %83 = vadd.xlane.f32.xlu1 %v82_v18  ;;  %72 = vadd.xlane.f32.xlu0 %v71_v20 }
 0x162   :  { %v62_v21 = vpop.xlane.xlu1 %61 }
 0x163   :  { %136 = vrcp.f32 %v62_v21 }
 0x166   :  { %v84_v22 = vpop.xlane.xlu1 %83  ;;  %v73_v23 = vpop.xlane.xlu0 %72 }
 0x167   :  { %138 = vrcp.f32 %v84_v22 }
 0x168   :  { %140 = vrcp.f32 %v73_v23 }
 0x16d   :  { %v137_v24 = vpop.eup %136 }
 0x16e   :  { %v64_v27 = vmul.f32 %v137_v24, %v131_v15 }
 0x171   :  { %v139_v25 = vpop.eup %138 }
 0x172   :  { %v141_v26 = vpop.eup %140  ;;  %v86_v28 = vmul.f32 %v139_v25, %v133_v16 }
 0x173   :  { %v75_v29 = vmul.f32 %v141_v26, %v135_v19 }
 0x174   :  { %v89_v30 = vsub.f32 %v64_v27, %v86_v28 }
 0x175   :  { %v87_v31 = vsub.f32 %v64_v27, %v75_v29 }
 0x176   :  { %v90_v32 = vmul.f32 %v89_v30, %v89_v30 }
 0x177   :  { %v88_v33 = vmul.f32 %v87_v31, %v87_v31 }
 0x179   :  { %v91_v34 = vsub.f32 %v88_v33, %v90_v32 }
 0x17b   :  { %v101_v35 = vsel %vm53_vm0, %v91_v34, 0.0 }
 0x17c   :  { %v102_v36 = vrot.slane %v101_v35, 4 }
 0x17e   :  { %v103_v37 = vadd.f32 %v102_v36, %v101_v35 }
 0x180   :  { %v104_v38 = vrot.slane %v103_v37, 2 }
 0x182   :  { %v105_v39 = vadd.f32 %v104_v38, %v103_v37 }
 0x184   :  { %v106_v40 = vrot.slane %v105_v39, 1 }
 0x186   :  { %v107_v41 = vadd.f32 %v106_v40, %v105_v39 }
 0x188   :  { %109 = vst.msk [vmem:[#allocation8] sm:$0x1] %vm108_vm1, %v107_v41 }
 0x189   :  { %219 = shalt.err (!%p216_p0)
}
 0x18a   :  { %s220_s24 = scalar_lea.hbm %s318_s3, 16 }
 0x18b   :  { %p221_p1 = scmp.ne.s32.totalorder %s318_s3, %s220_s24  ;;  %p224_p2 = scmp.lt.u32.totalorder %s220_s24, %s318_s3 }
 0x18d   :  { %p226_p3 = pnand %p224_p2, %p221_p1 }
 0x18f   :  { %229 = shalt.err (!%p226_p3)
}
 0x190   :  { %119 = dma.vmem_to_hbm [thread:$0]  %s117_s19, 16, %s318_s3, [#allocation4]  }
 0x191   :  { %234 = dma.done.wait [#allocation4], 16  }
 0x192   :  { %235 = vsyncadd [#allocation4], 4294967280 }
 0x193   :  { %123 = vsyncpa [#allocation3], 1 }
 0x194   :  { %124 = vsyncpa [#allocation6], 1 }
 0x195   :  { %125 = vsyncpa [#allocation4], 1 }

</bundles_post_ra>
